<compile_context>
chip_gen: v7x
topology: tpu7x:2x2x1
jax: 0.10.0
libtpu: 0.0.40
codegen_flags: <defaults>
</compile_context>

<pallas_src>
import math

import jax
import jax.numpy as jnp
from jax.experimental import pallas as pl
from jax.experimental.pallas import tpu as pltpu

# ---------------- model hyperparameters (small, consistent with the module) ---
B = 2          # batch
S = 8          # sequence length
HID = 32       # hid_dim
N_HEADS = 4    # n_heads
HEAD_DIM = HID // N_HEADS
PF = 64        # pf_dim
LN_EPS = 1e-5
SCALE = math.sqrt(HEAD_DIM)   # attention scale (sqrt(head_dim)), frozen buffer
INV_SCALE = 1.0 / SCALE

VEC_ROWS = 16  # packed bias / LN slab rows
VEC_LANES = 128


def _layer_norm(x, gamma, beta):
    # torch.nn.LayerNorm: biased variance over last dim, eps inside sqrt
    mean = jnp.mean(x, axis=-1, keepdims=True)
    var = jnp.mean((x - mean) ** 2, axis=-1, keepdims=True)
    return (x - mean) * jax.lax.rsqrt(var + LN_EPS) * gamma + beta


def encoding_layer_kernel(src_ref, wqkv_ref, wo_ref, w1_ref, w2_ref, vecs_ref, out_ref):
    x = src_ref[...]                                           # (B*S, HID) f32

    # ---- unpack the consolidated bias / LayerNorm slab (static slices) -----
    bo    = vecs_ref[0:1, 0:HID]
    ln1_g = vecs_ref[1:2, 0:HID]
    ln1_b = vecs_ref[2:3, 0:HID]
    b1    = vecs_ref[3:4, 0:PF]
    b2    = vecs_ref[4:5, 0:HID]
    ln2_g = vecs_ref[5:6, 0:HID]
    ln2_b = vecs_ref[6:7, 0:HID]

    # ---- head-major fused QKV projection ------------------------------------
    # wqkv_ref[h] is (HID, 3*HD) = [wq_h | wk_h | wv_h]; one small matmul per head,
    # then split each head into its B batch groups (row slices at multiples of 8
    # sublanes -> free).  Group index g = h*B + b.
    groups = []
    for h in range(N_HEADS):
        b_h = vecs_ref[8 + h:9 + h, 0:3 * HEAD_DIM]            # (1, 3*HD)
        qkv_h = jnp.dot(x, wqkv_ref[h],
                        preferred_element_type=jnp.float32) + b_h   # (B*S, 3*HD)
        for b in range(B):
            groups.append(qkv_h[b * S:(b + 1) * S])            # (S, 3*HD)
    qkv_g = jnp.stack(groups, axis=0)                          # (B*N_HEADS, S, 3*HD)

    q_g = qkv_g[:, :, 0:HEAD_DIM]
    k_g = qkv_g[:, :, HEAD_DIM:2 * HEAD_DIM]
    v_g = qkv_g[:, :, 2 * HEAD_DIM:3 * HEAD_DIM]

    # ---- single batched attention over all (batch, head) groups -------------
    sc = jnp.einsum('gqd,gkd->gqk', q_g, k_g,
                    preferred_element_type=jnp.float32) * INV_SCALE
    # (src_mask is None in this instantiation -> no masking)
    sc = sc - jnp.max(sc, axis=-1, keepdims=True)              # one reduction total
    p = jnp.exp(sc)
    alpha = p / jnp.sum(p, axis=-1, keepdims=True)             # exact divide (correctness)
    ctx_g = jnp.einsum('gqk,gkd->gqd', alpha, v_g,
                       preferred_element_type=jnp.float32)     # (B*N_HEADS, S, HD)

    # ---- output projection folded into per-head accumulation (no lane concat)
    wo = wo_ref[...]
    acc = None
    for h in range(N_HEADS):
        ctx_h = ctx_g[h * B:(h + 1) * B].reshape(B * S, HEAD_DIM)        # (B*S, HD)
        part = jnp.dot(ctx_h, wo[h * HEAD_DIM:(h + 1) * HEAD_DIM, :],
                       preferred_element_type=jnp.float32)
        acc = part if acc is None else acc + part
    attn = acc + bo                                            # (B*S, HID)

    # ---- residual + LayerNorm 1 ---------------------------------------------
    y = _layer_norm(x + attn, ln1_g, ln1_b)

    # ---- pointwise feed-forward ---------------------------------------------
    h1 = jnp.dot(y, w1_ref[...], preferred_element_type=jnp.float32) + b1
    h1 = jnp.maximum(h1, 0.0)                                  # relu
    ff = jnp.dot(h1, w2_ref[...], preferred_element_type=jnp.float32) + b2

    # ---- residual + LayerNorm 2 ---------------------------------------------
    out_ref[...] = _layer_norm(y + ff, ln2_g, ln2_b).astype(out_ref.dtype)


def _full_spec(shape):
    n = len(shape)
    return pl.BlockSpec(shape, lambda i: (0,) * n)


@jax.jit
def encoding_layer(src, params):
    (wq, bq, wk, bk, wv, bv, wo, bo,
     ln1_g, ln1_b, w1, b1, w2, b2, ln2_g, ln2_b) = params

    # ---- wrapper-side packing (tiny XLA ops, traced once) -------------------
    def head_cols(w, h):
        return w[:, h * HEAD_DIM:(h + 1) * HEAD_DIM]

    # head-major fused QKV weights: per head h, columns [wq_h | wk_h | wv_h]
    wqkv_hm = jnp.stack(
        [jnp.concatenate([head_cols(wq, h), head_cols(wk, h), head_cols(wv, h)], axis=1)
         for h in range(N_HEADS)], axis=0)                     # (N_HEADS, HID, 3*HD)

    def vec_row(v):
        v = v.reshape(1, -1).astype(jnp.float32)
        return jnp.pad(v, ((0, 0), (0, VEC_LANES - v.shape[1])))

    bqkv_rows = [
        vec_row(jnp.concatenate([head_cols(bq, h), head_cols(bk, h), head_cols(bv, h)], axis=1))
        for h in range(N_HEADS)]
    vecs = jnp.concatenate(
        [vec_row(bo), vec_row(ln1_g), vec_row(ln1_b), vec_row(b1), vec_row(b2),
         vec_row(ln2_g), vec_row(ln2_b), jnp.zeros((1, VEC_LANES), jnp.float32)]
        + bqkv_rows
        + [jnp.zeros((VEC_ROWS - 12, VEC_LANES), jnp.float32)],
        axis=0)                                                # (16, 128)

    src2 = src.reshape(B * S, HID)                             # batch folded into sublanes

    grid_spec = pltpu.PrefetchScalarGridSpec(
        num_scalar_prefetch=0,
        grid=(1,),                                             # single invocation
        in_specs=[
            _full_spec((B * S, HID)),                          # src slab
            _full_spec((N_HEADS, HID, 3 * HEAD_DIM)),          # head-major qkv weights
            _full_spec((HID, HID)),                            # wo
            _full_spec((HID, PF)),                             # fc1 w
            _full_spec((PF, HID)),                             # fc2 w
            _full_spec((VEC_ROWS, VEC_LANES)),                 # packed bias / LN slab
        ],
        out_specs=_full_spec((B * S, HID)),
    )

    out2 = pl.pallas_call(
        encoding_layer_kernel,
        out_shape=jax.ShapeDtypeStruct((B * S, HID), jnp.float32),
        grid_spec=grid_spec,
        compiler_params=pltpu.CompilerParams(
            dimension_semantics=("arbitrary",)),               # don't shard micro-kernel
    )(src2, wqkv_hm, wo, w1, w2, vecs)

    return out2.reshape(B, S, HID)


def init_params(key):
    ks = jax.random.split(key, 8)

    def lin(k, fan_in, fan_out):
        bound = 1.0 / math.sqrt(fan_in)
        kw, kb = jax.random.split(k)
        w = jax.random.uniform(kw, (fan_in, fan_out), jnp.float32, -bound, bound)
        b = jax.random.uniform(kb, (1, fan_out), jnp.float32, -bound, bound)
        return w, b

    wq, bq = lin(ks[0], HID, HID)
    wk, bk = lin(ks[1], HID, HID)
    wv, bv = lin(ks[2], HID, HID)
    wo, bo = lin(ks[3], HID, HID)
    w1, b1 = lin(ks[4], HID, PF)
    w2, b2 = lin(ks[5], PF, HID)
    ln1_g = jnp.ones((1, HID), jnp.float32)
    ln1_b = jnp.zeros((1, HID), jnp.float32)
    ln2_g = jnp.ones((1, HID), jnp.float32)
    ln2_b = jnp.zeros((1, HID), jnp.float32)
    return (wq, bq, wk, bk, wv, bv, wo, bo,
            ln1_g, ln1_b, w1, b1, w2, b2, ln2_g, ln2_b)


def reference(src, params):
    (wq, bq, wk, bk, wv, bv, wo, bo,
     ln1_g, ln1_b, w1, b1, w2, b2, ln2_g, ln2_b) = params

    def ln(x, g, b):
        m = jnp.mean(x, -1, keepdims=True)
        v = jnp.mean((x - m) ** 2, -1, keepdims=True)
        return (x - m) / jnp.sqrt(v + LN_EPS) * g + b

    q = src @ wq + bq
    k = src @ wk + bk
    v = src @ wv + bv

    def split(t):  # (B,S,H) -> (B,nh,S,hd)
        return t.reshape(B, S, N_HEADS, HEAD_DIM).transpose(0, 2, 1, 3)

    qh, kh, vh = split(q), split(k), split(v)
    score = jnp.einsum("bhqd,bhkd->bhqk", qh, kh) / SCALE
    alpha = jax.nn.softmax(score, axis=-1)
    ctx = jnp.einsum("bhqk,bhkd->bhqd", alpha, vh)
    ctx = ctx.transpose(0, 2, 1, 3).reshape(B, S, HID)
    attn = ctx @ wo + bo
    y = ln(src + attn, ln1_g, ln1_b)
    ff = jnp.maximum(y @ w1 + b1, 0.0) @ w2 + b2
    return ln(y + ff, ln2_g, ln2_b)


if __name__ == "__main__":
    key = jax.random.PRNGKey(0)
    k_src, k_par = jax.random.split(key)
    src = jax.random.normal(k_src, (B, S, HID), jnp.float32)
    params = init_params(k_par)

    out = encoding_layer(src, params)
    jax.block_until_ready(out)

    ref = reference(src, params)
    assert out.shape == (B, S, HID)
    # Exact softmax + f32 matmul operands -> only rounding-level differences remain
    # (tolerance covers MXU multi-pass rounding on HW; real bugs would be O(0.1+)).
    assert jnp.allclose(out, ref, rtol=2e-3, atol=2e-3), "mismatch vs reference"
    print("KERNEL_OK")
</pallas_src>

<mosaic_0001>
module attributes {stable_mosaic.version = 11 : i64} {
  func.func @encoding_layer_kernel(%arg0: i32, %arg1: memref<16x32xf32, #tpu.memory_space<vmem>>, %arg2: memref<4x32x24xf32, #tpu.memory_space<vmem>>, %arg3: memref<32x32xf32, #tpu.memory_space<vmem>>, %arg4: memref<32x64xf32, #tpu.memory_space<vmem>>, %arg5: memref<64x32xf32, #tpu.memory_space<vmem>>, %arg6: memref<16x128xf32, #tpu.memory_space<vmem>>, %arg7: memref<16x32xf32, #tpu.memory_space<vmem>>) attributes {dimension_semantics = [#tpu.dimension_semantics<arbitrary>], iteration_bounds = array<i64: 1>, scalar_prefetch = 0 : i64, scratch_operands = 0 : i64, tpu.core_type = #tpu.core_type<tc>, window_params = [{pipeline_mode = #tpu.pipeline_mode<synchronous>, transform_indices = @transform_0, window_bounds = array<i64: 16, 32>}, {pipeline_mode = #tpu.pipeline_mode<synchronous>, transform_indices = @transform_1, window_bounds = array<i64: 4, 32, 24>}, {pipeline_mode = #tpu.pipeline_mode<synchronous>, transform_indices = @transform_2, window_bounds = array<i64: 32, 32>}, {pipeline_mode = #tpu.pipeline_mode<synchronous>, transform_indices = @transform_3, window_bounds = array<i64: 32, 64>}, {pipeline_mode = #tpu.pipeline_mode<synchronous>, transform_indices = @transform_4, window_bounds = array<i64: 64, 32>}, {pipeline_mode = #tpu.pipeline_mode<synchronous>, transform_indices = @transform_5, window_bounds = array<i64: 16, 128>}, {pipeline_mode = #tpu.pipeline_mode<synchronous>, transform_indices = @transform_6, window_bounds = array<i64: 16, 32>}]} {
    %c0 = arith.constant 0 : index
    %c0_0 = arith.constant 0 : index
    %0 = vector.load %arg1[%c0, %c0_0] : memref<16x32xf32, #tpu.memory_space<vmem>>, vector<16x32xf32>
    %c0_1 = arith.constant 0 : index
    %c0_2 = arith.constant 0 : index
    %1 = vector.load %arg6[%c0_1, %c0_2] : memref<16x128xf32, #tpu.memory_space<vmem>>, vector<1x32xf32>
    %c1 = arith.constant 1 : index
    %c0_3 = arith.constant 0 : index
    %2 = vector.load %arg6[%c1, %c0_3] : memref<16x128xf32, #tpu.memory_space<vmem>>, vector<1x32xf32>
    %c2 = arith.constant 2 : index
    %c0_4 = arith.constant 0 : index
    %3 = vector.load %arg6[%c2, %c0_4] : memref<16x128xf32, #tpu.memory_space<vmem>>, vector<1x32xf32>
    %c3 = arith.constant 3 : index
    %c0_5 = arith.constant 0 : index
    %4 = vector.load %arg6[%c3, %c0_5] : memref<16x128xf32, #tpu.memory_space<vmem>>, vector<1x64xf32>
    %c4 = arith.constant 4 : index
    %c0_6 = arith.constant 0 : index
    %5 = vector.load %arg6[%c4, %c0_6] : memref<16x128xf32, #tpu.memory_space<vmem>>, vector<1x32xf32>
    %c5 = arith.constant 5 : index
    %c0_7 = arith.constant 0 : index
    %6 = vector.load %arg6[%c5, %c0_7] : memref<16x128xf32, #tpu.memory_space<vmem>>, vector<1x32xf32>
    %c6 = arith.constant 6 : index
    %c0_8 = arith.constant 0 : index
    %7 = vector.load %arg6[%c6, %c0_8] : memref<16x128xf32, #tpu.memory_space<vmem>>, vector<1x32xf32>
    %c8 = arith.constant 8 : index
    %c0_9 = arith.constant 0 : index
    %8 = vector.load %arg6[%c8, %c0_9] : memref<16x128xf32, #tpu.memory_space<vmem>>, vector<1x24xf32>
    %c0_10 = arith.constant 0 : index
    %c0_11 = arith.constant 0 : index
    %c0_12 = arith.constant 0 : index
    %9 = vector.load %arg2[%c0_10, %c0_11, %c0_12] : memref<4x32x24xf32, #tpu.memory_space<vmem>>, vector<1x32x24xf32>
    %10 = vector.shape_cast %9 : vector<1x32x24xf32> to vector<32x24xf32>
    %cst = arith.constant dense<0.000000e+00> : vector<16x24xf32>
    %11 = tpu.matmul %0, %10, %cst {dimension_numbers = #tpu.dot_dimension_numbers<[1], [0], [0], [1], [0, 0, 1, 1], [], []>} : vector<16x32xf32>, vector<32x24xf32>, vector<16x24xf32> -> vector<16x24xf32>
    %12 = vector.broadcast %8 : vector<1x24xf32> to vector<16x24xf32>
    %13 = arith.addf %11, %12 : vector<16x24xf32>
    %14 = vector.extract_strided_slice %13 {offsets = [0, 0], sizes = [8, 24], strides = [1, 1]} : vector<16x24xf32> to vector<8x24xf32>
    %15 = vector.extract_strided_slice %13 {offsets = [8, 0], sizes = [8, 24], strides = [1, 1]} : vector<16x24xf32> to vector<8x24xf32>
    %c9 = arith.constant 9 : index
    %c0_13 = arith.constant 0 : index
    %16 = vector.load %arg6[%c9, %c0_13] : memref<16x128xf32, #tpu.memory_space<vmem>>, vector<1x24xf32>
    %c1_14 = arith.constant 1 : index
    %c0_15 = arith.constant 0 : index
    %c0_16 = arith.constant 0 : index
    %17 = vector.load %arg2[%c1_14, %c0_15, %c0_16] : memref<4x32x24xf32, #tpu.memory_space<vmem>>, vector<1x32x24xf32>
    %18 = vector.shape_cast %17 : vector<1x32x24xf32> to vector<32x24xf32>
    %cst_17 = arith.constant dense<0.000000e+00> : vector<16x24xf32>
    %19 = tpu.matmul %0, %18, %cst_17 {dimension_numbers = #tpu.dot_dimension_numbers<[1], [0], [0], [1], [0, 0, 1, 1], [], []>} : vector<16x32xf32>, vector<32x24xf32>, vector<16x24xf32> -> vector<16x24xf32>
    %20 = vector.broadcast %16 : vector<1x24xf32> to vector<16x24xf32>
    %21 = arith.addf %19, %20 : vector<16x24xf32>
    %22 = vector.extract_strided_slice %21 {offsets = [0, 0], sizes = [8, 24], strides = [1, 1]} : vector<16x24xf32> to vector<8x24xf32>
    %23 = vector.extract_strided_slice %21 {offsets = [8, 0], sizes = [8, 24], strides = [1, 1]} : vector<16x24xf32> to vector<8x24xf32>
    %c10 = arith.constant 10 : index
    %c0_18 = arith.constant 0 : index
    %24 = vector.load %arg6[%c10, %c0_18] : memref<16x128xf32, #tpu.memory_space<vmem>>, vector<1x24xf32>
    %c2_19 = arith.constant 2 : index
    %c0_20 = arith.constant 0 : index
    %c0_21 = arith.constant 0 : index
    %25 = vector.load %arg2[%c2_19, %c0_20, %c0_21] : memref<4x32x24xf32, #tpu.memory_space<vmem>>, vector<1x32x24xf32>
    %26 = vector.shape_cast %25 : vector<1x32x24xf32> to vector<32x24xf32>
    %cst_22 = arith.constant dense<0.000000e+00> : vector<16x24xf32>
    %27 = tpu.matmul %0, %26, %cst_22 {dimension_numbers = #tpu.dot_dimension_numbers<[1], [0], [0], [1], [0, 0, 1, 1], [], []>} : vector<16x32xf32>, vector<32x24xf32>, vector<16x24xf32> -> vector<16x24xf32>
    %28 = vector.broadcast %24 : vector<1x24xf32> to vector<16x24xf32>
    %29 = arith.addf %27, %28 : vector<16x24xf32>
    %30 = vector.extract_strided_slice %29 {offsets = [0, 0], sizes = [8, 24], strides = [1, 1]} : vector<16x24xf32> to vector<8x24xf32>
    %31 = vector.extract_strided_slice %29 {offsets = [8, 0], sizes = [8, 24], strides = [1, 1]} : vector<16x24xf32> to vector<8x24xf32>
    %c11 = arith.constant 11 : index
    %c0_23 = arith.constant 0 : index
    %32 = vector.load %arg6[%c11, %c0_23] : memref<16x128xf32, #tpu.memory_space<vmem>>, vector<1x24xf32>
    %c3_24 = arith.constant 3 : index
    %c0_25 = arith.constant 0 : index
    %c0_26 = arith.constant 0 : index
    %33 = vector.load %arg2[%c3_24, %c0_25, %c0_26] : memref<4x32x24xf32, #tpu.memory_space<vmem>>, vector<1x32x24xf32>
    %34 = vector.shape_cast %33 : vector<1x32x24xf32> to vector<32x24xf32>
    %cst_27 = arith.constant dense<0.000000e+00> : vector<16x24xf32>
    %35 = tpu.matmul %0, %34, %cst_27 {dimension_numbers = #tpu.dot_dimension_numbers<[1], [0], [0], [1], [0, 0, 1, 1], [], []>} : vector<16x32xf32>, vector<32x24xf32>, vector<16x24xf32> -> vector<16x24xf32>
    %36 = vector.broadcast %32 : vector<1x24xf32> to vector<16x24xf32>
    %37 = arith.addf %35, %36 : vector<16x24xf32>
    %38 = vector.extract_strided_slice %37 {offsets = [0, 0], sizes = [8, 24], strides = [1, 1]} : vector<16x24xf32> to vector<8x24xf32>
    %39 = vector.extract_strided_slice %37 {offsets = [8, 0], sizes = [8, 24], strides = [1, 1]} : vector<16x24xf32> to vector<8x24xf32>
    %40 = vector.shape_cast %14 : vector<8x24xf32> to vector<1x8x24xf32>
    %41 = vector.shape_cast %15 : vector<8x24xf32> to vector<1x8x24xf32>
    %42 = vector.shape_cast %22 : vector<8x24xf32> to vector<1x8x24xf32>
    %43 = vector.shape_cast %23 : vector<8x24xf32> to vector<1x8x24xf32>
    %44 = vector.shape_cast %30 : vector<8x24xf32> to vector<1x8x24xf32>
    %45 = vector.shape_cast %31 : vector<8x24xf32> to vector<1x8x24xf32>
    %46 = vector.shape_cast %38 : vector<8x24xf32> to vector<1x8x24xf32>
    %47 = vector.shape_cast %39 : vector<8x24xf32> to vector<1x8x24xf32>
    %48 = tpu.concatenate %40, %41, %42, %43, %44, %45, %46, %47 in 0 : vector<1x8x24xf32>, vector<1x8x24xf32>, vector<1x8x24xf32>, vector<1x8x24xf32>, vector<1x8x24xf32>, vector<1x8x24xf32>, vector<1x8x24xf32>, vector<1x8x24xf32> -> vector<8x8x24xf32>
    %49 = vector.extract_strided_slice %48 {offsets = [0, 0, 0], sizes = [8, 8, 8], strides = [1, 1, 1]} : vector<8x8x24xf32> to vector<8x8x8xf32>
    %50 = vector.extract_strided_slice %48 {offsets = [0, 0, 8], sizes = [8, 8, 8], strides = [1, 1, 1]} : vector<8x8x24xf32> to vector<8x8x8xf32>
    %51 = vector.extract_strided_slice %48 {offsets = [0, 0, 16], sizes = [8, 8, 8], strides = [1, 1, 1]} : vector<8x8x24xf32> to vector<8x8x8xf32>
    "tpu.trace_start"() <{level = 10 : i32, message = "gqd,gkd->gqk"}> : () -> ()
    %cst_28 = arith.constant dense<0.000000e+00> : vector<8x8x8xf32>
    %52 = tpu.matmul %49, %50, %cst_28 {dimension_numbers = #tpu.dot_dimension_numbers<[2], [2], [1], [1], [0, 0, 0, 1, 1, 1], [0], [0]>} : vector<8x8x8xf32>, vector<8x8x8xf32>, vector<8x8x8xf32> -> vector<8x8x8xf32>
    "tpu.trace_stop"() : () -> ()
    %cst_29 = arith.constant 0.353553385 : f32
    %53 = vector.broadcast %cst_29 : f32 to vector<8x8x8xf32>
    %54 = arith.mulf %52, %53 : vector<8x8x8xf32>
    %cst_30 = arith.constant dense<0xFF800000> : vector<8x8xf32>
    %55 = vector.multi_reduction <maximumf>, %54, %cst_30 [2] : vector<8x8x8xf32> to vector<8x8xf32>
    %56 = vector.shape_cast %55 : vector<8x8xf32> to vector<8x8x1xf32>
    %57 = vector.broadcast %56 : vector<8x8x1xf32> to vector<8x8x8xf32>
    %58 = arith.subf %54, %57 : vector<8x8x8xf32>
    %59 = math.exp %58 : vector<8x8x8xf32>
    %cst_31 = arith.constant dense<0.000000e+00> : vector<8x8xf32>
    %60 = vector.multi_reduction <add>, %59, %cst_31 [2] : vector<8x8x8xf32> to vector<8x8xf32>
    %61 = vector.shape_cast %60 : vector<8x8xf32> to vector<8x8x1xf32>
    %62 = vector.broadcast %61 : vector<8x8x1xf32> to vector<8x8x8xf32>
    %63 = arith.divf %59, %62 : vector<8x8x8xf32>
    "tpu.trace_start"() <{level = 10 : i32, message = "gqk,gkd->gqd"}> : () -> ()
    %cst_32 = arith.constant dense<0.000000e+00> : vector<8x8x8xf32>
    %64 = tpu.matmul %63, %51, %cst_32 {dimension_numbers = #tpu.dot_dimension_numbers<[2], [1], [1], [2], [0, 0, 0, 1, 1, 2], [0], [0]>} : vector<8x8x8xf32>, vector<8x8x8xf32>, vector<8x8x8xf32> -> vector<8x8x8xf32>
    "tpu.trace_stop"() : () -> ()
    %c0_33 = arith.constant 0 : index
    %c0_34 = arith.constant 0 : index
    %65 = vector.load %arg3[%c0_33, %c0_34] : memref<32x32xf32, #tpu.memory_space<vmem>>, vector<32x32xf32>
    %66 = vector.extract_strided_slice %64 {offsets = [0, 0, 0], sizes = [2, 8, 8], strides = [1, 1, 1]} : vector<8x8x8xf32> to vector<2x8x8xf32>
    %67 = vector.shape_cast %66 : vector<2x8x8xf32> to vector<16x8xf32>
    %68 = vector.extract_strided_slice %65 {offsets = [0, 0], sizes = [8, 32], strides = [1, 1]} : vector<32x32xf32> to vector<8x32xf32>
    %cst_35 = arith.constant dense<0.000000e+00> : vector<16x32xf32>
    %69 = tpu.matmul %67, %68, %cst_35 {dimension_numbers = #tpu.dot_dimension_numbers<[1], [0], [0], [1], [0, 0, 1, 1], [], []>} : vector<16x8xf32>, vector<8x32xf32>, vector<16x32xf32> -> vector<16x32xf32>
    %70 = vector.extract_strided_slice %64 {offsets = [2, 0, 0], sizes = [2, 8, 8], strides = [1, 1, 1]} : vector<8x8x8xf32> to vector<2x8x8xf32>
    %71 = vector.shape_cast %70 : vector<2x8x8xf32> to vector<16x8xf32>
    %72 = vector.extract_strided_slice %65 {offsets = [8, 0], sizes = [8, 32], strides = [1, 1]} : vector<32x32xf32> to vector<8x32xf32>
    %cst_36 = arith.constant dense<0.000000e+00> : vector<16x32xf32>
    %73 = tpu.matmul %71, %72, %cst_36 {dimension_numbers = #tpu.dot_dimension_numbers<[1], [0], [0], [1], [0, 0, 1, 1], [], []>} : vector<16x8xf32>, vector<8x32xf32>, vector<16x32xf32> -> vector<16x32xf32>
    %74 = arith.addf %69, %73 : vector<16x32xf32>
    %75 = vector.extract_strided_slice %64 {offsets = [4, 0, 0], sizes = [2, 8, 8], strides = [1, 1, 1]} : vector<8x8x8xf32> to vector<2x8x8xf32>
    %76 = vector.shape_cast %75 : vector<2x8x8xf32> to vector<16x8xf32>
    %77 = vector.extract_strided_slice %65 {offsets = [16, 0], sizes = [8, 32], strides = [1, 1]} : vector<32x32xf32> to vector<8x32xf32>
    %cst_37 = arith.constant dense<0.000000e+00> : vector<16x32xf32>
    %78 = tpu.matmul %76, %77, %cst_37 {dimension_numbers = #tpu.dot_dimension_numbers<[1], [0], [0], [1], [0, 0, 1, 1], [], []>} : vector<16x8xf32>, vector<8x32xf32>, vector<16x32xf32> -> vector<16x32xf32>
    %79 = arith.addf %74, %78 : vector<16x32xf32>
    %80 = vector.extract_strided_slice %64 {offsets = [6, 0, 0], sizes = [2, 8, 8], strides = [1, 1, 1]} : vector<8x8x8xf32> to vector<2x8x8xf32>
    %81 = vector.shape_cast %80 : vector<2x8x8xf32> to vector<16x8xf32>
    %82 = vector.extract_strided_slice %65 {offsets = [24, 0], sizes = [8, 32], strides = [1, 1]} : vector<32x32xf32> to vector<8x32xf32>
    %cst_38 = arith.constant dense<0.000000e+00> : vector<16x32xf32>
    %83 = tpu.matmul %81, %82, %cst_38 {dimension_numbers = #tpu.dot_dimension_numbers<[1], [0], [0], [1], [0, 0, 1, 1], [], []>} : vector<16x8xf32>, vector<8x32xf32>, vector<16x32xf32> -> vector<16x32xf32>
    %84 = arith.addf %79, %83 : vector<16x32xf32>
    %85 = vector.broadcast %1 : vector<1x32xf32> to vector<16x32xf32>
    %86 = arith.addf %84, %85 : vector<16x32xf32>
    %87 = arith.addf %0, %86 : vector<16x32xf32>
    %cst_39 = arith.constant dense<0.000000e+00> : vector<16xf32>
    %88 = vector.multi_reduction <add>, %87, %cst_39 [1] : vector<16x32xf32> to vector<16xf32>
    %89 = vector.shape_cast %88 : vector<16xf32> to vector<16x1xf32>
    %cst_40 = arith.constant 3.200000e+01 : f32
    %90 = vector.broadcast %cst_40 : f32 to vector<16x1xf32>
    %91 = arith.divf %89, %90 : vector<16x1xf32>
    %92 = vector.broadcast %91 : vector<16x1xf32> to vector<16x32xf32>
    %93 = arith.subf %87, %92 : vector<16x32xf32>
    %94 = arith.mulf %93, %93 : vector<16x32xf32>
    %cst_41 = arith.constant dense<0.000000e+00> : vector<16xf32>
    %95 = vector.multi_reduction <add>, %94, %cst_41 [1] : vector<16x32xf32> to vector<16xf32>
    %96 = vector.shape_cast %95 : vector<16xf32> to vector<16x1xf32>
    %cst_42 = arith.constant 3.200000e+01 : f32
    %97 = vector.broadcast %cst_42 : f32 to vector<16x1xf32>
    %98 = arith.divf %96, %97 : vector<16x1xf32>
    %99 = vector.broadcast %91 : vector<16x1xf32> to vector<16x32xf32>
    %100 = arith.subf %87, %99 : vector<16x32xf32>
    %cst_43 = arith.constant 9.99999974E-6 : f32
    %101 = vector.broadcast %cst_43 : f32 to vector<16x1xf32>
    %102 = arith.addf %98, %101 : vector<16x1xf32>
    %103 = math.rsqrt %102 : vector<16x1xf32>
    %104 = vector.broadcast %103 : vector<16x1xf32> to vector<16x32xf32>
    %105 = arith.mulf %100, %104 : vector<16x32xf32>
    %106 = vector.broadcast %2 : vector<1x32xf32> to vector<16x32xf32>
    %107 = arith.mulf %105, %106 : vector<16x32xf32>
    %108 = vector.broadcast %3 : vector<1x32xf32> to vector<16x32xf32>
    %109 = arith.addf %107, %108 : vector<16x32xf32>
    %c0_44 = arith.constant 0 : index
    %c0_45 = arith.constant 0 : index
    %110 = vector.load %arg4[%c0_44, %c0_45] : memref<32x64xf32, #tpu.memory_space<vmem>>, vector<32x64xf32>
    %cst_46 = arith.constant dense<0.000000e+00> : vector<16x64xf32>
    %111 = tpu.matmul %109, %110, %cst_46 {dimension_numbers = #tpu.dot_dimension_numbers<[1], [0], [0], [1], [0, 0, 1, 1], [], []>} : vector<16x32xf32>, vector<32x64xf32>, vector<16x64xf32> -> vector<16x64xf32>
    %112 = vector.broadcast %4 : vector<1x64xf32> to vector<16x64xf32>
    %113 = arith.addf %111, %112 : vector<16x64xf32>
    %cst_47 = arith.constant 0.000000e+00 : f32
    %114 = vector.broadcast %cst_47 : f32 to vector<16x64xf32>
    %115 = arith.maximumf %113, %114 : vector<16x64xf32>
    %c0_48 = arith.constant 0 : index
    %c0_49 = arith.constant 0 : index
    %116 = vector.load %arg5[%c0_48, %c0_49] : memref<64x32xf32, #tpu.memory_space<vmem>>, vector<64x32xf32>
    %cst_50 = arith.constant dense<0.000000e+00> : vector<16x32xf32>
    %117 = tpu.matmul %115, %116, %cst_50 {dimension_numbers = #tpu.dot_dimension_numbers<[1], [0], [0], [1], [0, 0, 1, 1], [], []>} : vector<16x64xf32>, vector<64x32xf32>, vector<16x32xf32> -> vector<16x32xf32>
    %118 = vector.broadcast %5 : vector<1x32xf32> to vector<16x32xf32>
    %119 = arith.addf %117, %118 : vector<16x32xf32>
    %120 = arith.addf %109, %119 : vector<16x32xf32>
    %cst_51 = arith.constant dense<0.000000e+00> : vector<16xf32>
    %121 = vector.multi_reduction <add>, %120, %cst_51 [1] : vector<16x32xf32> to vector<16xf32>
    %122 = vector.shape_cast %121 : vector<16xf32> to vector<16x1xf32>
    %cst_52 = arith.constant 3.200000e+01 : f32
    %123 = vector.broadcast %cst_52 : f32 to vector<16x1xf32>
    %124 = arith.divf %122, %123 : vector<16x1xf32>
    %125 = vector.broadcast %124 : vector<16x1xf32> to vector<16x32xf32>
    %126 = arith.subf %120, %125 : vector<16x32xf32>
    %127 = arith.mulf %126, %126 : vector<16x32xf32>
    %cst_53 = arith.constant dense<0.000000e+00> : vector<16xf32>
    %128 = vector.multi_reduction <add>, %127, %cst_53 [1] : vector<16x32xf32> to vector<16xf32>
    %129 = vector.shape_cast %128 : vector<16xf32> to vector<16x1xf32>
    %cst_54 = arith.constant 3.200000e+01 : f32
    %130 = vector.broadcast %cst_54 : f32 to vector<16x1xf32>
    %131 = arith.divf %129, %130 : vector<16x1xf32>
    %132 = vector.broadcast %124 : vector<16x1xf32> to vector<16x32xf32>
    %133 = arith.subf %120, %132 : vector<16x32xf32>
    %cst_55 = arith.constant 9.99999974E-6 : f32
    %134 = vector.broadcast %cst_55 : f32 to vector<16x1xf32>
    %135 = arith.addf %131, %134 : vector<16x1xf32>
    %136 = math.rsqrt %135 : vector<16x1xf32>
    %137 = vector.broadcast %136 : vector<16x1xf32> to vector<16x32xf32>
    %138 = arith.mulf %133, %137 : vector<16x32xf32>
    %139 = vector.broadcast %6 : vector<1x32xf32> to vector<16x32xf32>
    %140 = arith.mulf %138, %139 : vector<16x32xf32>
    %141 = vector.broadcast %7 : vector<1x32xf32> to vector<16x32xf32>
    %142 = arith.addf %140, %141 : vector<16x32xf32>
    %c0_56 = arith.constant 0 : index
    %c0_57 = arith.constant 0 : index
    %143 = vector.load %arg7[%c0_56, %c0_57] : memref<16x32xf32, #tpu.memory_space<vmem>>, vector<16x32xf32>
    tpu.vector_store %arg7[%c0_56, %c0_57], %142 {strides = array<i32>} : memref<16x32xf32, #tpu.memory_space<vmem>>, vector<16x32xf32>,
    return
  }
  func.func @transform_0(%arg0: i32) -> (i32, i32) {
    %c0_i32 = arith.constant 0 : i32
    %c0_i32_0 = arith.constant 0 : i32
    %c0_i32_1 = arith.constant 0 : i32
    return %c0_i32, %c0_i32_0 : i32, i32
  }
  func.func @transform_1(%arg0: i32) -> (i32, i32, i32) {
    %c0_i32 = arith.constant 0 : i32
    %c0_i32_0 = arith.constant 0 : i32
    %c0_i32_1 = arith.constant 0 : i32
    %c0_i32_2 = arith.constant 0 : i32
    return %c0_i32, %c0_i32_0, %c0_i32_1 : i32, i32, i32
  }
  func.func @transform_2(%arg0: i32) -> (i32, i32) {
    %c0_i32 = arith.constant 0 : i32
    %c0_i32_0 = arith.constant 0 : i32
    %c0_i32_1 = arith.constant 0 : i32
    return %c0_i32, %c0_i32_0 : i32, i32
  }
  func.func @transform_3(%arg0: i32) -> (i32, i32) {
    %c0_i32 = arith.constant 0 : i32
    %c0_i32_0 = arith.constant 0 : i32
    %c0_i32_1 = arith.constant 0 : i32
    return %c0_i32, %c0_i32_0 : i32, i32
  }
  func.func @transform_4(%arg0: i32) -> (i32, i32) {
    %c0_i32 = arith.constant 0 : i32
    %c0_i32_0 = arith.constant 0 : i32
    %c0_i32_1 = arith.constant 0 : i32
    return %c0_i32, %c0_i32_0 : i32, i32
  }
  func.func @transform_5(%arg0: i32) -> (i32, i32) {
    %c0_i32 = arith.constant 0 : i32
    %c0_i32_0 = arith.constant 0 : i32
    %c0_i32_1 = arith.constant 0 : i32
    return %c0_i32, %c0_i32_0 : i32, i32
  }
  func.func @transform_6(%arg0: i32) -> (i32, i32) {
    %c0_i32 = arith.constant 0 : i32
    %c0_i32_0 = arith.constant 0 : i32
    %c0_i32_1 = arith.constant 0 : i32
    return %c0_i32, %c0_i32_0 : i32, i32
  }
}

</mosaic_0001>

<bundles_post_ra>
// kernel: encoding_layer.1
= control target key start
LH: loop header
LB: loop body
LE: loop exit
PB: predicated region body
PF: predicated region fallthrough
CT: control target
= control target key end

     0   :  { %vm42_vm0 = vcmask 261120   ;;  %s3154_s0 = inlined_call_operand.vmem [shape: f32[16,32], index: 0, kind: input, shape index: {}]   ;;  %s3155_s1 = inlined_call_operand.vmem [shape: f32[4,32,24], index: 1, kind: input, shape index: {}]   ;;  %s3156_s2 = inlined_call_operand.vmem [shape: f32[32,32], index: 2, kind: input, shape index: {}]   ;;  %s3157_s3 = inlined_call_operand.vmem [shape: f32[32,64], index: 3, kind: input, shape index: {}]   ;;  %s3158_s4 = inlined_call_operand.vmem [shape: f32[64,32], index: 4, kind: input, shape index: {}]   ;;  %s3159_s5 = inlined_call_operand.vmem [shape: f32[16,128], index: 5, kind: input, shape index: {}]   ;;  %s3160_s6 = inlined_call_operand.hbm [shape: f32[16,32], index: 6, kind: output, shape index: {}]  }
   0x1   :  { %v34_v0 = vld [vmem:[%s3155_s1] sm:$0xff]  ;;  %v35_v1 = vld [vmem:[%s3155_s1 + $0x8] sm:$0xff]  ;;  %v36_v5 = vld [vmem:[%s3155_s1 + $0x10] sm:$0xff] }
   0x2   :  { %v2325_v2 = vld [vmem:[%s3155_s1 + $0x20] sm:$0xff]  ;;  %v2647_v3 = vpack.c.bf16 %v35_v1, %v34_v0  ;;  %v2326_v4 = vld [vmem:[%s3155_s1 + $0x28] sm:$0xff]  ;;  %v37_v6 = vld [vmem:[%s3155_s1 + $0x18] sm:$0xff] }
   0x3   :  { %v2655_v7 = vpack.c.bf16 %v2326_v4, %v2325_v2  ;;  %v2651_v8 = vpack.c.bf16 %v37_v6, %v36_v5  ;;  %v2327_v9 = vld [vmem:[%s3155_s1 + $0x30] sm:$0xff]  ;;  %v2328_v10 = vld [vmem:[%s3155_s1 + $0x38] sm:$0xff]  ;;  %v2849_v11 = vld [vmem:[%s3154_s0] sm:$0xff] }
   0x4   :  { %2648 = vmatprep.subr.bf16.mxu0 %v2647_v3  ;;  %v2659_v12 = vpack.c.bf16 %v2328_v10, %v2327_v9  ;;  %2481 = vmatprep.mubr.msk.f32.mxu0 %vm42_vm0, %v2849_v11  ;;  %v2332_v13 = vld [vmem:[%s3155_s1 + $0x40] sm:$0xff]  ;;  %v2333_v14 = vld [vmem:[%s3155_s1 + $0x48] sm:$0xff]  ;;  %v2334_v18 = vld [vmem:[%s3155_s1 + $0x50] sm:$0xff] }
   0x5   :  { %2656 = vmatprep.subr.bf16.mxu1 %v2655_v7  ;;  %2650 = vmatpush3.bf16.msra.mxu0 %v2647_v3  ;;  %v2339_v15 = vld [vmem:[%s3155_s1 + $0x60] sm:$0xff]  ;;  %v2663_v16 = vpack.c.bf16 %v2333_v14, %v2332_v13  ;;  %v2340_v17 = vld [vmem:[%s3155_s1 + $0x68] sm:$0xff]  ;;  %v2335_v19 = vld [vmem:[%s3155_s1 + $0x58] sm:$0xff] }
   0x6   :  { %2658 = vmatpush3.bf16.msra.mxu1 %v2655_v7  ;;  %2652 = vmatprep.subr.bf16.mxu0 %v2651_v8  ;;  %v2671_v20 = vpack.c.bf16 %v2340_v17, %v2339_v15 }
   0x7   :  { %2660 = vmatprep.subr.bf16.mxu1 %v2659_v12  ;;  %2492 = vmatprep.mubr.msk.f32.mxu1 %vm42_vm0, %v2849_v11 }
   0x8   :  { %11 = vsyncpa [#allocation3], 0  ;;  %v2341_v21 = vld [vmem:[%s3155_s1 + $0x70] sm:$0xff]  ;;  %v2342_v22 = vld [vmem:[%s3155_s1 + $0x78] sm:$0xff]  ;;  %v2667_v24 = vpack.c.bf16 %v2335_v19, %v2334_v18  ;;  %v2780_v26 = vmov 0.0   ;;  %vm2781_vm1 = vmmov 0  }
   0x9   :  { %2654 = vmatpush3.bf16.msra.mxu0 %v2651_v8  ;;  %v2882_v23 = vld [vmem:[%s3154_s0 + $0x8] sm:$0xff]  ;;  %v2675_v25 = vpack.c.bf16 %v2342_v22, %v2341_v21  ;;  %s2782_s11 = smov 120   ;;  %s2783_s16 = smov 112   ;;  %vm382_vm2 = vcmask 64512   ;;  %vm2182_vm3 = vcmask 523264  }
   0xa   :  { %2662 = vmatpush3.bf16.msra.mxu1 %v2659_v12  ;;  %2664 = vmatprep.subr.bf16.mxu0 %v2663_v16  ;;  %v2322_v27 = vld [vmem:[%s3159_s5 + $0x8] ss:$0 sm:$0xff]  ;;  %v2329_v29 = vld [vmem:[%s3159_s5 + $0x9] ss:$0 sm:$0xff]  ;;  %v2336_v36 = vld [vmem:[%s3159_s5 + $0xa] ss:$0 sm:$0xff] }
   0xb   :  { %2672 = vmatprep.subr.bf16.mxu1 %v2671_v20  ;;  %v2343_v43 = vld [vmem:[%s3159_s5 + $0xb] ss:$0 sm:$0xff]  ;;  %s2784_s0 = smov [#allocation2]  }
   0xc   :  { %2482 = vmatmul.mubr.msk.f32.vlgmr.msra.gmra.mrb[0].mxu0 %vm42_vm0, %v2882_v23  ;;  %s2311_s1 = sshll.u32 %s2784_s0, 4  ;;  %s2312_s1 = int_to_ptr.vmem [resolvable:$true] %s2311_s1 }
   0xd   :  { %2493 = vmatmul.mubr.msk.f32.vlgmr.msra.gmra.mrb[0].mxu1 %vm42_vm0, %v2882_v23  ;;  %2666 = vmatpush3.bf16.msra.mxu0 %v2663_v16  ;;  %s2756_s9 = scalar_lea.vmem %s2312_s1, 256  ;;  %p2761_p1 = scmp.lt.s32.totalorder %s2312_s1, %s2312_s1 }
   0xe   :  { %2668 = vmatprep.subr.bf16.mxu0 %v2667_v24  ;;  %2674 = vmatpush3.bf16.msra.mxu1 %v2671_v20  ;;  %p2757_p0 = scmp.ne.s32.totalorder %s2312_s1, %s2756_s9  ;;  %p2762_p2 = scmp.lt.s32.totalorder %s2756_s9, %s2756_s9 }
   0xf   :  { %2503 = vmatprep.mubr.msk.f32.mxu0 %vm42_vm0, %v2849_v11  ;;  %2676 = vmatprep.subr.bf16.mxu1 %v2675_v25 }
  0x10   :  { %2514 = vmatprep.mubr.msk.f32.mxu1 %vm42_vm0, %v2849_v11  ;;  %p2763_p3 = por %p2762_p2, %p2761_p1 }
  0x11   :  { %2670 = vmatpush3.bf16.msra.mxu0 %v2667_v24 }
  0x12   :  { %2678 = vmatpush3.bf16.msra.mxu1 %v2675_v25  ;;  %2517 = vmatprep.subr.mxu0 %v2780_v26  ;;  %p2764_p4 = pnand %p2763_p3, %p2757_p0 }
  0x13   :  { %2532 = vmatprep.subr.mxu1 %v2780_v26 }
  0x14   :  { %2504 = vmatmul.mubr.msk.f32.vlgmr.msra.gmra.mrb[2].mxu0 %vm42_vm0, %v2882_v23 }
  0x15   :  { %2515 = vmatmul.mubr.msk.f32.vlgmr.msra.gmra.mrb[2].mxu1 %vm42_vm0, %v2882_v23  ;;  %2519 = vmatprep.mubr.msk.f32.mxu0 %vm2781_vm1, %v2780_v26 }
  0x16   :  { %2534 = vmatprep.mubr.msk.f32.mxu1 %vm2781_vm1, %v2780_v26 }
  0xdf   :  { %v2483_v28 = vpop.f32.mrb[0].mxu0 }
  0xe0   :  { %v2494_v30 = vpop.f32.mrb[0].mxu1  ;;  %v115_v31 = vpop.f32.mrb[1].mxu0  ;;  %v2910_v35 = vadd.f32 %v2483_v28, %v2322_v27 }
  0xe1   :  { %v116_v32 = vadd.f32 %v2322_v27, %v115_v31  ;;  %v200_v33 = vpop.f32.mrb[1].mxu1  ;;  %v2916_v37 = vadd.f32 %v2494_v30, %v2329_v29 }
  0xe2   :  { %v2908_v34 = vadd.f32 %v2329_v29, %v200_v33 }
  0xe3   :  { %380 = vrot.lane.b32.xlu0 %v116_v32, %s2782_s11 }
  0xe4   :  { %535 = vrot.lane.b32.xlu1 %v2908_v34, %s2782_s11 }
  0xe7   :  { %458 = vrot.lane.b32.xlu0 %v2910_v35, %s2782_s11  ;;  %v2505_v38 = vpop.f32.mrb[2].mxu0 }
  0xe8   :  { %612 = vrot.lane.b32.xlu1 %v2916_v37, %s2782_s11  ;;  %v2920_v39 = vadd.f32 %v2505_v38, %v2336_v36  ;;  %v285_v40 = vpop.f32.mrb[3].mxu0  ;;  %v2516_v41 = vpop.f32.mrb[2].mxu1 }
  0xe9   :  { %v2922_v42 = vadd.f32 %v2336_v36, %v285_v40  ;;  %v370_v44 = vpop.f32.mrb[3].mxu1  ;;  %v2931_v46 = vadd.f32 %v2516_v41, %v2343_v43 }
  0xea   :  { %v2928_v45 = vadd.f32 %v2343_v43, %v370_v44 }
  0xeb   :  { %689 = vrot.lane.b32.xlu0 %v2922_v42, %s2782_s11 }
  0xec   :  { %766 = vrot.lane.b32.xlu1 %v2920_v39, %s2782_s11 }
  0xef   :  { %843 = vrot.lane.b32.xlu0 %v2928_v45, %s2782_s11 }
  0xf0   :  { %920 = vrot.lane.b32.xlu1 %v2931_v46, %s2782_s11 }
  0xf4   :  { %1092 = vrot.lane.b32.xlu1 %v116_v32, %s2783_s16 }
 0x155   :  { %v381_v47 = vpop.permute.xlu0 %380 }
 0x156   :  { %v536_v48 = vpop.permute.xlu1 %535  ;;  %2518 = vmatpush3.xpose.msk.msra.mxu0 %vm382_vm2, %v381_v47 }
 0x157   :  { %2522 = vmatprep.subr.mxu0 %v2780_v26 }
 0x159   :  { %2520 = vmatmul.mubr.msk.f32.vlgmr.msra.gmra.mrb[4].mxu0 %vm382_vm2, %v116_v32  ;;  %v459_v49 = vpop.permute.xlu0 %458 }
 0x15a   :  { %v613_v50 = vpop.permute.xlu1 %612  ;;  %2523 = vmatpush3.xpose.msk.msra.mxu0 %vm382_vm2, %v459_v49  ;;  %2524 = vmatprep.mubr.msk.f32.mxu0 %vm2781_vm1, %v2780_v26 }
 0x15b   :  { %2533 = vmatpush3.xpose.msk.msra.mxu1 %vm382_vm2, %v613_v50  ;;  %2527 = vmatprep.subr.mxu0 %v2780_v26 }
 0x15c   :  { %2542 = vmatprep.subr.mxu1 %v2780_v26 }
 0x15d   :  { %2525 = vmatmul.mubr.msk.f32.vlgmr.msra.gmra.mrb[6].mxu0 %vm382_vm2, %v2910_v35  ;;  %v690_v51 = vpop.permute.xlu0 %689 }
 0x15e   :  { %2535 = vmatmul.mubr.msk.f32.vlgmr.msra.gmra.mrb[4].mxu1 %vm382_vm2, %v2916_v37  ;;  %v767_v52 = vpop.permute.xlu1 %766  ;;  %2528 = vmatpush3.xpose.msk.msra.mxu0 %vm382_vm2, %v536_v48 }
 0x15f   :  { %2543 = vmatpush3.xpose.msk.msra.mxu1 %vm382_vm2, %v767_v52  ;;  %2529 = vmatprep.mubr.msk.f32.mxu0 %vm2781_vm1, %v2780_v26 }
 0x160   :  { %2544 = vmatprep.mubr.msk.f32.mxu1 %vm2781_vm1, %v2780_v26  ;;  %2552 = vmatprep.subr.mxu1 %v2780_v26 }
 0x161   :  { %2530 = vmatmul.mubr.msk.f32.vlgmr.msra.gmra.mrb[8].mxu0 %vm382_vm2, %v2908_v34  ;;  %2537 = vmatprep.subr.mxu0 %v2780_v26  ;;  %v844_v54 = vpop.permute.xlu0 %843 }
 0x162   :  { %2545 = vmatmul.mubr.msk.f32.vlgmr.msra.gmra.mrb[6].mxu1 %vm382_vm2, %v2920_v39  ;;  %v921_v53 = vpop.permute.xlu1 %920  ;;  %2538 = vmatpush3.xpose.msk.msra.mxu0 %vm382_vm2, %v690_v51 }
 0x163   :  { %2553 = vmatpush3.xpose.msk.msra.mxu1 %vm382_vm2, %v921_v53  ;;  %2539 = vmatprep.mubr.msk.f32.mxu0 %vm2781_vm1, %v2780_v26 }
 0x164   :  { %2554 = vmatprep.mubr.msk.f32.mxu1 %vm2781_vm1, %v2780_v26  ;;  %2547 = vmatprep.subr.mxu0 %v2780_v26 }
 0x165   :  { %2540 = vmatmul.mubr.msk.f32.vlgmr.msra.gmra.mrb[10].mxu0 %vm382_vm2, %v2922_v42  ;;  %2562 = vmatprep.subr.mxu1 %v2780_v26 }
 0x166   :  { %2555 = vmatmul.mubr.msk.f32.vlgmr.msra.gmra.mrb[8].mxu1 %vm382_vm2, %v2931_v46  ;;  %2548 = vmatpush3.xpose.msk.msra.mxu0 %vm382_vm2, %v844_v54  ;;  %v1093_v55 = vpop.permute.xlu1 %1092 }
 0x167   :  { %2549 = vmatprep.mubr.msk.f32.mxu0 %vm2781_vm1, %v2780_v26  ;;  %2557 = vmatprep.subr.mxu0 %v2780_v26 }
 0x168   :  { %2564 = vmatprep.mubr.msk.f32.mxu1 %vm2781_vm1, %v2780_v26 }
 0x169   :  { %2550 = vmatmul.mubr.msk.f32.vlgmr.msra.gmra.mrb[12].mxu0 %vm382_vm2, %v2928_v45 }
 0x16a   :  { %2558 = vmatpush3.msra.mxu0 %v1093_v55  ;;  %2559 = vmatprep.mubr.msk.f32.mxu0 %vm2781_vm1, %v2780_v26 }
 0x16b   :  { %2567 = vmatprep.subr.mxu0 %v2780_v26 }
 0x22c   :  { %v453_v56 = vpop.f32.mrb[4].mxu0 }
 0x22d   :  { %v2521_v57 = vpop.f32.mrb[5].mxu0  ;;  %v996_v1 = vmul.f32 0.35355338, %v453_v56 }
 0x22f   :  { %v1004_v8 = vsel %vm382_vm2, %v996_v1, -inf }
 0x230   :  { %v530_v58 = vpop.f32.mrb[6].mxu0 }
 0x231   :  { %v997_v59 = vmul.f32 0.35355338, %v530_v58  ;;  %v684_v60 = vpop.f32.mrb[4].mxu1  ;;  %v2526_v61 = vpop.f32.mrb[7].mxu0 }
 0x232   :  { %v999_v62 = vmul.f32 0.35355338, %v684_v60  ;;  %v2536_v63 = vpop.f32.mrb[5].mxu1 }
 0x233   :  { %v1007_v0 = vsel %vm382_vm2, %v997_v59, -inf }
 0x234   :  { %v1013_v2 = vsel %vm382_vm2, %v999_v62, -inf  ;;  %1008 = vmax.xlane.f32.xlu1 %v1007_v0  ;;  %v607_v3 = vpop.f32.mrb[8].mxu0 }
 0x235   :  { %v838_v4 = vpop.f32.mrb[6].mxu1  ;;  %1014 = vmax.xlane.f32.xlu0 %v1013_v2  ;;  %v2531_v5 = vpop.f32.mrb[9].mxu0  ;;  %v998_v14 = vmul.f32 0.35355338, %v607_v3 }
 0x236   :  { %v2546_v6 = vpop.f32.mrb[7].mxu1  ;;  %v1001_v7 = vmul.f32 0.35355338, %v838_v4 }
 0x237   :  { %v1010_v19 = vsel %vm382_vm2, %v998_v14, -inf }
 0x238   :  { %v761_v9 = vpop.f32.mrb[10].mxu0  ;;  %v1019_v15 = vsel %vm382_vm2, %v1001_v7, -inf }
 0x239   :  { %v992_v10 = vpop.f32.mrb[8].mxu1  ;;  %1005 = vmax.xlane.f32.xlu0 %v1004_v8  ;;  %v2541_v12 = vpop.f32.mrb[11].mxu0  ;;  %v1000_v21 = vmul.f32 0.35355338, %v761_v9 }
 0x23a   :  { %v2556_v13 = vpop.f32.mrb[9].mxu1  ;;  %v1003_v18 = vmul.f32 0.35355338, %v992_v10 }
 0x23b   :  { %v1016_v24 = vsel %vm382_vm2, %v1000_v21, -inf }
 0x23c   :  { %v915_v16 = vpop.f32.mrb[12].mxu0  ;;  %v1025_v20 = vsel %vm382_vm2, %v1003_v18, -inf }
 0x23d   :  { %1020 = vmax.xlane.f32.xlu0 %v1019_v15  ;;  %v2551_v17 = vpop.f32.mrb[13].mxu0  ;;  %v1002_v22 = vmul.f32 0.35355338, %v915_v16 }
 0x23f   :  { %v1022_v25 = vsel %vm382_vm2, %v1002_v22, -inf }
 0x241   :  { %1011 = vmax.xlane.f32.xlu0 %v1010_v19 }
 0x245   :  { %1026 = vmax.xlane.f32.xlu0 %v1025_v20  ;;  %1244 = vrot.lane.b32.xlu1 %v2908_v34, %s2783_s16 }
 0x25b   :  { %1168 = vrot.lane.b32.xlu0 %v2910_v35, %s2783_s16 }
 0x269   :  { %1017 = vmax.xlane.f32.xlu1 %v1016_v24 }
 0x26d   :  { %1023 = vmax.xlane.f32.xlu1 %v1022_v25 }
 0x2c1   :  { %v1009_v27 = vpop.xlane.xlu1 %1008 }
 0x2c2   :  { %v1029_v28 = vsub.f32 %v997_v59, %v1009_v27  ;;  %v1015_v29 = vpop.xlane.xlu0 %1014 }
 0x2c3   :  { %v1031_v30 = vsub.f32 %v999_v62, %v1015_v29 }
 0x2c4   :  { %v1038_v31 = vmul.f32 1.442695, %v1029_v28 }
 0x2c5   :  { %v1042_v32 = vmul.f32 1.442695, %v1031_v30 }
 0x2c6   :  { %v1006_v33 = vpop.xlane.xlu0 %1005 }
 0x2c7   :  { %2716 = vpow2.f32 %v1042_v32  ;;  %v1028_v34 = vsub.f32 %v996_v1, %v1006_v33 }
 0x2c8   :  { %2718 = vpow2.f32 %v1038_v31 }
 0x2c9   :  { %v1036_v36 = vmul.f32 1.442695, %v1028_v34 }
 0x2ca   :  { %v1021_v35 = vpop.xlane.xlu0 %1020 }
 0x2cb   :  { %2720 = vpow2.f32 %v1036_v36  ;;  %v1033_v51 = vsub.f32 %v1001_v7, %v1021_v35 }
 0x2cd   :  { %v1046_v53 = vmul.f32 1.442695, %v1033_v51 }
 0x2ce   :  { %v1012_v38 = vpop.xlane.xlu0 %1011 }
 0x2cf   :  { %v1030_v52 = vsub.f32 %v998_v14, %v1012_v38  ;;  %2722 = vpow2.f32 %v1046_v53  ;;  %v1701_v38 = vld [vmem:[%s3156_s2 + $0x8] sm:$0xff] }
 0x2d1   :  { %v2996_v40 = vpop.eup %2716  ;;  %v1040_v54 = vmul.f32 1.442695, %v1030_v52  ;;  %v1702_v52 = vld [vmem:[%s3156_s2 + $0x10] sm:$0xff] }
 0x2d2   :  { %v1027_v41 = vpop.xlane.xlu0 %1026  ;;  %v1061_v43 = vsel %vm382_vm2, %v2996_v40, 0.0  ;;  %v2719_v44 = vpop.eup %2718 }
 0x2d3   :  { %1062 = vadd.xlane.f32.xlu0 %v1061_v43  ;;  %v1055_v49 = vsel %vm382_vm2, %v2719_v44, 0.0  ;;  %v1035_v55 = vsub.f32 %v1003_v18, %v1027_v41  ;;  %2724 = vpow2.f32 %v1040_v54  ;;  %v1703_v54 = vld [vmem:[%s3156_s2 + $0x18] sm:$0xff] }
 0x2d5   :  { %v2721_v47 = vpop.eup %2720  ;;  %v1050_v56 = vmul.f32 1.442695, %v1035_v55 }
 0x2d6   :  { %v1169_v48 = vpop.permute.xlu0 %1168  ;;  %v1052_v50 = vsel %vm382_vm2, %v2721_v47, 0.0 }
 0x2d7   :  { %1056 = vadd.xlane.f32.xlu0 %v1055_v49  ;;  %1053 = vadd.xlane.f32.xlu1 %v1052_v50  ;;  %2726 = vpow2.f32 %v1050_v56 }
 0x2d8   :  { %2563 = vmatpush3.msra.mxu1 %v1169_v48 }
 0x2d9   :  { %2572 = vmatprep.subr.mxu1 %v2780_v26  ;;  %v2723_v57 = vpop.eup %2722 }
 0x2da   :  { %v1067_v59 = vsel %vm382_vm2, %v2723_v57, 0.0 }
 0x2dd   :  { %v2725_v58 = vpop.eup %2724 }
 0x2de   :  { %v1058_v60 = vsel %vm382_vm2, %v2725_v58, 0.0 }
 0x2e1   :  { %v3009_v61 = vpop.eup %2726 }
 0x2e8   :  { %1396 = vrot.lane.b32.xlu1 %v2922_v42, %s2783_s16  ;;  %v1245_v42 = vpop.permute.xlu1 %1244 }
 0x2ed   :  { %1320 = vrot.lane.b32.xlu0 %v2916_v37, %s2783_s16  ;;  %v1073_v37 = vsel %vm382_vm2, %v3009_v61, 0.0 }
 0x2f6   :  { %v1018_v62 = vpop.xlane.xlu1 %1017 }
 0x2f7   :  { %v1032_v63 = vsub.f32 %v1000_v21, %v1018_v62 }
 0x2f9   :  { %v1044_v1 = vmul.f32 1.442695, %v1032_v63 }
 0x2fa   :  { %v1024_v0 = vpop.xlane.xlu1 %1023 }
 0x2fb   :  { %v1034_v2 = vsub.f32 %v1002_v22, %v1024_v0  ;;  %2728 = vpow2.f32 %v1044_v1 }
 0x2fd   :  { %v1048_v3 = vmul.f32 1.442695, %v1034_v2 }
 0x2ff   :  { %2730 = vpow2.f32 %v1048_v3 }
 0x305   :  { %v2729_v4 = vpop.eup %2728 }
 0x306   :  { %v1064_v5 = vsel %vm382_vm2, %v2729_v4, 0.0 }
 0x309   :  { %v3018_v6 = vpop.eup %2730 }
 0x30c   :  { %1068 = vadd.xlane.f32.xlu0 %v1067_v59  ;;  %1059 = vadd.xlane.f32.xlu1 %v1058_v60 }
 0x310   :  { %1074 = vadd.xlane.f32.xlu0 %v1073_v37 }
 0x31d   :  { %1472 = vrot.lane.b32.xlu1 %v2920_v39, %s2783_s16  ;;  %v1070_v39 = vsel %vm382_vm2, %v3018_v6, 0.0 }
 0x326   :  { %1548 = vrot.lane.b32.xlu0 %v2928_v45, %s2783_s16 }
 0x341   :  { %1065 = vadd.xlane.f32.xlu1 %v1064_v5 }
 0x345   :  { %1071 = vadd.xlane.f32.xlu1 %v1070_v39 }
 0x356   :  { %1624 = vrot.lane.b32.xlu1 %v2931_v46, %s2783_s16 }
 0x360   :  { %v1063_v45 = vpop.xlane.xlu0 %1062 }
 0x364   :  { %v1054_v7 = vpop.xlane.xlu1 %1053  ;;  %v1057_v8 = vpop.xlane.xlu0 %1056 }
 0x365   :  { %2732 = vrcp.f32 %v1054_v7 }
 0x366   :  { %2734 = vrcp.f32 %v1057_v8 }
 0x367   :  { %2736 = vrcp.f32 %v1063_v45 }
 0x368   :  { %v1321_v15 = vpop.permute.xlu0 %1320  ;;  %v1397_v16 = vpop.permute.xlu1 %1396 }
 0x36f   :  { %v2733_v9 = vpop.eup %2732 }
 0x370   :  { %v2735_v10 = vpop.eup %2734  ;;  %v1077_v12 = vmul.f32 %v2733_v9, %v2721_v47 }
 0x371   :  { %v1079_v13 = vmul.f32 %v2735_v10, %v2719_v44  ;;  %v2737_v14 = vpop.eup %2736 }
 0x372   :  { %2560 = vmatmul.mubr.msk.f32.vlgmr.msra.gmra.mrb[14].mxu0 %vm382_vm2, %v1077_v12  ;;  %v1083_v46 = vmul.f32 %v2737_v14, %v2996_v40  ;;  %v1700_v40 = vld [vmem:[%s3156_s2] sm:$0xff]  ;;  %v2080_v12 = vld [vmem:[%s3157_s3 + $0x8] sm:$0xff]  ;;  %v2081_v14 = vld [vmem:[%s3157_s3 + $0x10] sm:$0xff] }
 0x373   :  { %2565 = vmatmul.mubr.msk.f32.vlgmr.msra.gmra.mrb[10].mxu1 %vm382_vm2, %v1079_v13  ;;  %2568 = vmatpush3.msra.mxu0 %v1245_v42 }
 0x374   :  { %2573 = vmatpush3.msra.mxu1 %v1321_v15  ;;  %2574 = vmatprep.mubr.msk.f32.mxu1 %vm2781_vm1, %v2780_v26  ;;  %v2082_v15 = vld [vmem:[%s3157_s3 + $0x18] sm:$0xff] }
 0x375   :  { %2582 = vmatprep.subr.mxu1 %v2780_v26  ;;  %2569 = vmatprep.mubr.msk.f32.mxu0 %vm2781_vm1, %v2780_v26 }
 0x376   :  { %2577 = vmatprep.subr.mxu0 %v2780_v26 }
 0x377   :  { %2575 = vmatmul.mubr.msk.f32.vlgmr.msra.gmra.mrb[12].mxu1 %vm382_vm2, %v1083_v46  ;;  %v2683_v46 = vpack.c.bf16 %v2082_v15, %v2081_v14  ;;  %v2387_v14 = vld [vmem:[%s3159_s5 + $0x5] ss:$0 sm:$0xff] }
 0x378   :  { %2584 = vmatprep.mubr.msk.f32.mxu1 %vm2781_vm1, %v2780_v26 }
 0x399   :  { %v1060_v17 = vpop.xlane.xlu1 %1059  ;;  %v1069_v18 = vpop.xlane.xlu0 %1068 }
 0x39a   :  { %2738 = vrcp.f32 %v1060_v17  ;;  %v2171_v17 = vld [vmem:[%s3158_s4 + $0x8] sm:$0xff] }
 0x39b   :  { %2740 = vrcp.f32 %v1069_v18 }
 0x39d   :  { %v1473_v19 = vpop.permute.xlu1 %1472  ;;  %v1075_v25 = vpop.xlane.xlu0 %1074 }
 0x39e   :  { %2583 = vmatpush3.msra.mxu1 %v1473_v19  ;;  %2742 = vrcp.f32 %v1075_v25 }
 0x39f   :  { %2592 = vmatprep.subr.mxu1 %v2780_v26 }
 0x3a1   :  { %v1549_v34 = vpop.permute.xlu0 %1548 }
 0x3a4   :  { %v2739_v20 = vpop.eup %2738 }
 0x3a5   :  { %v2741_v21 = vpop.eup %2740  ;;  %v1081_v22 = vmul.f32 %v2739_v20, %v2725_v58 }
 0x3a6   :  { %v1087_v24 = vmul.f32 %v2741_v21, %v2723_v57 }
 0x3a7   :  { %2570 = vmatmul.mubr.msk.f32.vlgmr.msra.gmra.mrb[16].mxu0 %vm382_vm2, %v1081_v22 }
 0x3a8   :  { %2578 = vmatpush3.msra.mxu0 %v1397_v16  ;;  %2585 = vmatmul.mubr.msk.f32.vlgmr.msra.gmra.mrb[14].mxu1 %vm382_vm2, %v1087_v24  ;;  %v2743_v29 = vpop.eup %2742  ;;  %v2170_v16 = vld [vmem:[%s3158_s4] sm:$0xff] }
 0x3a9   :  { %2594 = vmatprep.mubr.msk.f32.mxu1 %vm2781_vm1, %v2780_v26  ;;  %2579 = vmatprep.mubr.msk.f32.mxu0 %vm2781_vm1, %v2780_v26  ;;  %v1091_v30 = vmul.f32 %v2743_v29, %v3009_v61  ;;  %v2378_v61 = vld [vmem:[%s3159_s5] ss:$0 sm:$0xff]  ;;  %v2687_v18 = vpack.c.bf16 %v2171_v17, %v2170_v16  ;;  %v2388_v17 = vld [vmem:[%s3159_s5 + $0x6] ss:$0 sm:$0xff] }
 0x3aa   :  { %2587 = vmatprep.subr.mxu0 %v2780_v26 }
 0x3ce   :  { %v1066_v27 = vpop.xlane.xlu1 %1065 }
 0x3cf   :  { %2744 = vrcp.f32 %v1066_v27 }
 0x3d2   :  { %v1072_v28 = vpop.xlane.xlu1 %1071 }
 0x3d3   :  { %2746 = vrcp.f32 %v1072_v28  ;;  %v2379_v28 = vld [vmem:[%s3159_s5 + $0x1] ss:$0 sm:$0xff] }
 0x3d6   :  { %v1625_v31 = vpop.permute.xlu1 %1624 }
 0x3d7   :  { %2593 = vmatpush3.msra.mxu1 %v1625_v31 }
 0x3d8   :  { %2595 = vmatmul.mubr.msk.f32.vlgmr.msra.gmra.mrb[16].mxu1 %vm382_vm2, %v1091_v30  ;;  %v2380_v30 = vld [vmem:[%s3159_s5 + $0x2] ss:$0 sm:$0xff] }
 0x3d9   :  { %v2745_v32 = vpop.eup %2744 }
 0x3da   :  { %v1085_v33 = vmul.f32 %v2745_v32, %v2729_v4 }
 0x3dc   :  { %2580 = vmatmul.mubr.msk.f32.vlgmr.msra.gmra.mrb[18].mxu0 %vm382_vm2, %v1085_v33 }
 0x3dd   :  { %v2747_v36 = vpop.eup %2746  ;;  %2588 = vmatpush3.msra.mxu0 %v1549_v34  ;;  %2589 = vmatprep.mubr.msk.f32.mxu0 %vm2781_vm1, %v2780_v26 }
 0x3de   :  { %v1089_v35 = vmul.f32 %v2747_v36, %v3018_v6  ;;  %2597 = vmatprep.subr.mxu0 %v1701_v38  ;;  %v2172_v36 = vld [vmem:[%s3158_s4 + $0x10] sm:$0xff] }
 0x3e0   :  { %2590 = vmatmul.mubr.msk.f32.vlgmr.msra.gmra.mrb[20].mxu0 %vm382_vm2, %v1089_v35  ;;  %v2173_v35 = vld [vmem:[%s3158_s4 + $0x18] sm:$0xff] }
 0x3e1   :  { %2598 = vmatpush3.msra.mxu0 %v1701_v38 }
 0x3e2   :  { %2602 = vmatprep.subr.mxu0 %v1700_v40 }
 0x445   :  { %v1164_v41 = vpop.f32.mrb[14].mxu0 }
 0x446   :  { %v1240_v43 = vpop.f32.mrb[10].mxu1  ;;  %v2561_v44 = vpop.f32.mrb[15].mxu0 }
 0x447   :  { %v2566_v47 = vpop.f32.mrb[11].mxu1  ;;  %v2175_v44 = vld [vmem:[%s3158_s4 + $0x28] sm:$0xff] }
 0x44a   :  { %v1392_v26 = vpop.f32.mrb[12].mxu1 }
 0x44b   :  { %v2576_v48 = vpop.f32.mrb[13].mxu1 }
 0x44c   :  { %v2177_v48 = vld [vmem:[%s3158_s4 + $0x38] sm:$0xff] }
 0x47a   :  { %v1316_v49 = vpop.f32.mrb[16].mxu0 }
 0x47b   :  { %v1544_v50 = vpop.f32.mrb[14].mxu1  ;;  %v2571_v51 = vpop.f32.mrb[17].mxu0  ;;  %2599 = vmatprep.mubr.msk.f32.mxu0 %vm382_vm2, %v1316_v49 }
 0x47c   :  { %v2586_v53 = vpop.f32.mrb[15].mxu1  ;;  %2600 = vmatmul.mubr.msk.f32.vlgmr.msra.gmra.mrb[22].mxu0 %vm382_vm2, %v1392_v26  ;;  %v2176_v26 = vld [vmem:[%s3158_s4 + $0x30] sm:$0xff] }
 0x47d   :  { %2604 = vmatprep.mubr.msk.f32.mxu0 %vm382_vm2, %v1164_v41  ;;  %2603 = vmatpush3.msra.mxu0 %v1700_v40  ;;  %v2691_v41 = vpack.c.bf16 %v2173_v35, %v2172_v36  ;;  %v2699_v49 = vpack.c.bf16 %v2177_v48, %v2176_v26 }
 0x47e   :  { %2607 = vmatprep.subr.mxu0 %v1702_v52 }
 0x484   :  { %2605 = vmatmul.mubr.msk.f32.vlgmr.msra.gmra.mrb[22].mxu0 %vm382_vm2, %v1240_v43  ;;  %v2174_v43 = vld [vmem:[%s3158_s4 + $0x20] sm:$0xff] }
 0x485   :  { %2608 = vmatpush3.msra.mxu0 %v1702_v52  ;;  %v2695_v47 = vpack.c.bf16 %v2175_v44, %v2174_v43 }
 0x486   :  { %2612 = vmatprep.subr.mxu0 %v1703_v54 }
 0x4ab   :  { %v1696_v55 = vpop.f32.mrb[16].mxu1 }
 0x4ac   :  { %v2596_v56 = vpop.f32.mrb[17].mxu1 }
 0x4af   :  { %v1468_v57 = vpop.f32.mrb[18].mxu0 }
 0x4b0   :  { %v2581_v58 = vpop.f32.mrb[19].mxu0  ;;  %2609 = vmatprep.mubr.msk.f32.mxu0 %vm382_vm2, %v1468_v57  ;;  %v2384_v57 = vld [vmem:[%s3159_s5 + $0x4] ss:$0 sm:$0xff] }
 0x4b1   :  { %2610 = vmatmul.mubr.msk.f32.vlgmr.msra.gmra.mrb[22].mxu0 %vm382_vm2, %v1544_v50  ;;  %v2381_v50 = vld [vmem:[%s3159_s5 + $0x3] ss:$0 sm:$0xff] }
 0x4b2   :  { %2613 = vmatpush3.msra.mxu0 %v1703_v54 }
 0x4b3   :  { %v1620_v59 = vpop.f32.mrb[20].mxu0 }
 0x4b4   :  { %v2591_v60 = vpop.f32.mrb[21].mxu0  ;;  %2614 = vmatprep.mubr.msk.f32.mxu0 %vm382_vm2, %v1620_v59 }
 0x4b9   :  { %2615 = vmatmul.mubr.msk.f32.vlgmr.msra.gmra.mrb[22].mxu0 %vm382_vm2, %v1696_v55 }
 0x58c   :  { %v2616_v37 = vpop.f32.mrb[22].mxu0 }
 0x58d   :  { %v2037_v42 = vadd.f32 %v2616_v37, %v2378_v61  ;;  %v2021_v62 = vpop.f32.mrb[23].mxu0 }
 0x58e   :  { %v2036_v63 = vadd.f32 %v2378_v61, %v2021_v62 }
 0x58f   :  { %v2039_v0 = vadd.f32 %v2037_v42, %v2882_v23 }
 0x590   :  { %v2038_v1 = vadd.f32 %v2036_v63, %v2849_v11  ;;  %v2079_v11 = vld [vmem:[%s3157_s3] sm:$0xff] }
 0x591   :  { %v2043_v2 = vsel %vm42_vm0, %v2039_v0, 0.0  ;;  %v2679_v13 = vpack.c.bf16 %v2080_v12, %v2079_v11 }
 0x592   :  { %2044 = vadd.xlane.f32.xlu1 %v2043_v2  ;;  %v2040_v3 = vsel %vm42_vm0, %v2038_v1, 0.0 }
 0x593   :  { %2041 = vadd.xlane.f32.xlu0 %v2040_v3  ;;  %2680 = vmatprep.subr.bf16.mxu1 %v2679_v13 }
 0x594   :  { %2682 = vmatpush3.bf16.msra.mxu1 %v2679_v13 }
 0x595   :  { %2684 = vmatprep.subr.bf16.mxu1 %v2683_v46 }
 0x598   :  { %2686 = vmatpush3.bf16.msra.mxu1 %v2683_v46 }
 0x599   :  { %2688 = vmatprep.subr.bf16.mxu1 %v2687_v18 }
 0x61f   :  { %v2045_v4 = vpop.xlane.xlu1 %2044 }
 0x620   :  { %v2048_v5 = vmul.f32 0.03125, %v2045_v4  ;;  %v2042_v6 = vpop.xlane.xlu0 %2041 }
 0x621   :  { %v2047_v39 = vmul.f32 0.03125, %v2042_v6 }
 0x622   :  { %v2050_v45 = vsub.f32 %v2039_v0, %v2048_v5 }
 0x623   :  { %v2049_v7 = vsub.f32 %v2038_v1, %v2047_v39 }
 0x624   :  { %v2052_v10 = vmul.f32 %v2050_v45, %v2050_v45 }
 0x625   :  { %v2051_v8 = vmul.f32 %v2049_v7, %v2049_v7 }
 0x626   :  { %v2056_v23 = vsel %vm42_vm0, %v2052_v10, 0.0 }
 0x627   :  { %v2053_v9 = vsel %vm42_vm0, %v2051_v8, 0.0 }
 0x628   :  { %2054 = vadd.xlane.f32.xlu0 %v2053_v9 }
 0x62c   :  { %2057 = vadd.xlane.f32.xlu0 %v2056_v23 }
 0x6b5   :  { %v2055_v19 = vpop.xlane.xlu0 %2054 }
 0x6b6   :  { %v2059_v20 = vmul.f32 0.03125, %v2055_v19 }
 0x6b8   :  { %v2061_v21 = vadd.f32 1e-05, %v2059_v20 }
 0x6b9   :  { %v2058_v22 = vpop.xlane.xlu0 %2057 }
 0x6ba   :  { %2748 = vrsqrt.f32 %v2061_v21  ;;  %v2060_v24 = vmul.f32 0.03125, %v2058_v22 }
 0x6bc   :  { %v2062_v25 = vadd.f32 1e-05, %v2060_v24 }
 0x6be   :  { %2750 = vrsqrt.f32 %v2062_v25 }
 0x6c4   :  { %v2749_v27 = vpop.eup %2748 }
 0x6c5   :  { %v2065_v29 = vmul.f32 %v2749_v27, %v2049_v7 }
 0x6c7   :  { %v2071_v31 = vmul.f32 %v2379_v28, %v2065_v29 }
 0x6c8   :  { %v2751_v32 = vpop.eup %2750 }
 0x6c9   :  { %v2066_v33 = vmul.f32 %v2751_v32, %v2050_v45  ;;  %v2077_v34 = vadd.f32 %v2380_v30, %v2071_v31 }
 0x6cb   :  { %v2072_v38 = vmul.f32 %v2379_v28, %v2066_v33  ;;  %2625 = vmatprep.mubr.msk.f32.mxu1 %vm42_vm0, %v2077_v34 }
 0x6cd   :  { %v2078_v40 = vadd.f32 %v2380_v30, %v2072_v38 }
 0x6cf   :  { %2626 = vmatmul.mubr.msk.f32.vlgmr.msra.gmra.mrb[18].mxu1 %vm42_vm0, %v2078_v40 }
 0x6d0   :  { %2690 = vmatpush3.bf16.msra.mxu1 %v2687_v18 }
 0x6d1   :  { %2692 = vmatprep.subr.bf16.mxu1 %v2691_v41 }
 0x6d4   :  { %2694 = vmatpush3.bf16.msra.mxu1 %v2691_v41 }
 0x6d5   :  { %2696 = vmatprep.subr.bf16.mxu1 %v2695_v47 }
 0x6d8   :  { %2698 = vmatpush3.bf16.msra.mxu1 %v2695_v47 }
 0x6d9   :  { %2700 = vmatprep.subr.bf16.mxu1 %v2699_v49 }
 0x6dc   :  { %2702 = vmatpush3.bf16.msra.mxu1 %v2699_v49 }
 0x7a2   :  { %v2627_v51 = vpop.f32.mrb[18].mxu1 }
 0x7a3   :  { %v2165_v52 = vadd.f32 %v2627_v51, %v2381_v50  ;;  %v2159_v53 = vpop.f32.mrb[19].mxu1 }
 0x7a4   :  { %v2160_v54 = vadd.f32 %v2381_v50, %v2159_v53 }
 0x7a5   :  { %v2169_v56 = vmax.f32 %v2165_v52, 0.0 }
 0x7a6   :  { %v2168_v55 = vmax.f32 %v2160_v54, 0.0 }
 0x7a8   :  { %2644 = vmatprep.mubr.msk.f32.mxu1 %vm2182_vm3, %v2168_v55 }
 0x7a9   :  { %2645 = vmatmul.mubr.msk.f32.vlgmr.msra.gmra.mrb[20].mxu1 %vm2182_vm3, %v2169_v56 }
 0x87c   :  { %v2646_v58 = vpop.f32.mrb[20].mxu1 }
 0x87d   :  { %v2261_v59 = vadd.f32 %v2646_v58, %v2384_v57  ;;  %v2255_v60 = vpop.f32.mrb[21].mxu1 }
 0x87e   :  { %v2256_v61 = vadd.f32 %v2384_v57, %v2255_v60 }
 0x87f   :  { %v2265_v37 = vadd.f32 %v2261_v59, %v2078_v40 }
 0x880   :  { %v2264_v42 = vadd.f32 %v2256_v61, %v2077_v34 }
 0x881   :  { %v2269_v62 = vsel %vm42_vm0, %v2265_v37, 0.0 }
 0x882   :  { %2270 = vadd.xlane.f32.xlu0 %v2269_v62  ;;  %v2266_v63 = vsel %vm42_vm0, %v2264_v42, 0.0 }
 0x883   :  { %2267 = vadd.xlane.f32.xlu1 %v2266_v63 }
 0x90f   :  { %v2271_v0 = vpop.xlane.xlu0 %2270 }
 0x910   :  { %v2273_v1 = vmul.f32 0.03125, %v2271_v0  ;;  %v2268_v2 = vpop.xlane.xlu1 %2267 }
 0x911   :  { %v2272_v3 = vmul.f32 0.03125, %v2268_v2 }
 0x912   :  { %v2275_v4 = vsub.f32 %v2265_v37, %v2273_v1 }
 0x913   :  { %v2274_v5 = vsub.f32 %v2264_v42, %v2272_v3 }
 0x914   :  { %v2277_v6 = vmul.f32 %v2275_v4, %v2275_v4 }
 0x915   :  { %v2276_v39 = vmul.f32 %v2274_v5, %v2274_v5 }
 0x916   :  { %v2281_v45 = vsel %vm42_vm0, %v2277_v6, 0.0 }
 0x917   :  { %2282 = vadd.xlane.f32.xlu0 %v2281_v45  ;;  %v2278_v7 = vsel %vm42_vm0, %v2276_v39, 0.0 }
 0x918   :  { %2279 = vadd.xlane.f32.xlu1 %v2278_v7 }
 0x9a4   :  { %v2283_v8 = vpop.xlane.xlu0 %2282 }
 0x9a5   :  { %v2285_v9 = vmul.f32 0.03125, %v2283_v8  ;;  %v2280_v10 = vpop.xlane.xlu1 %2279 }
 0x9a6   :  { %v2284_v23 = vmul.f32 0.03125, %v2280_v10 }
 0x9a7   :  { %v2287_v11 = vadd.f32 1e-05, %v2285_v9 }
 0x9a8   :  { %v2286_v12 = vadd.f32 1e-05, %v2284_v23 }
 0x9a9   :  { %2752 = vrsqrt.f32 %v2287_v11 }
 0x9aa   :  { %2754 = vrsqrt.f32 %v2286_v12 }
 0x9b3   :  { %v2753_v13 = vpop.eup %2752 }
 0x9b4   :  { %v2755_v15 = vpop.eup %2754  ;;  %v2291_v46 = vmul.f32 %v2753_v13, %v2275_v4 }
 0x9b5   :  { %v2290_v16 = vmul.f32 %v2755_v15, %v2274_v5 }
 0x9b6   :  { %v2297_v18 = vmul.f32 %v2387_v14, %v2291_v46 }
 0x9b7   :  { %v2296_v19 = vmul.f32 %v2387_v14, %v2290_v16 }
 0x9b8   :  { %v2303_v20 = vadd.f32 %v2388_v17, %v2297_v18 }
 0x9b9   :  { %v2302_v21 = vadd.f32 %v2388_v17, %v2296_v19 }
 0x9ba   :  { %2305 = vst.msk [vmem:[#allocation2 + $0x8] sm:$0xff] %vm42_vm0, %v2303_v20 }
 0x9bb   :  { %2304 = vst.msk [vmem:[#allocation2] sm:$0xff] %vm42_vm0, %v2302_v21 }
 0x9bc   :  { %2767 = shalt.err (!%p2764_p4)
}
 0x9bd   :  { %s2768_s11 = scalar_lea.hbm %s3160_s6, 256 }
 0x9be   :  { %p2769_p5 = scmp.ne.s32.totalorder %s3160_s6, %s2768_s11  ;;  %p2772_p6 = scmp.lt.u32.totalorder %s2768_s11, %s3160_s6 }
 0x9c0   :  { %p2774_p7 = pnand %p2772_p6, %p2769_p5 }
 0x9c2   :  { %2777 = shalt.err (!%p2774_p7)
}
 0x9c3   :  { %s2785_s15 = smov 128   ;;  %s2786_s16 = smov 8  }
 0x9c4   :  { %2317 = dma.vmem_to_hbm [thread:$0]  %s2312_s1, 256, %s3160_s6, [#allocation3], %s2785_s15, %s2785_s15, %s2786_s16  }
 0x9c5   :  { %2778 = dma.done.wait [#allocation3], 256  }
 0x9c6   :  { %2779 = vsyncadd [#allocation3], 4294967040 }
 0x9c7   :  { %2321 = vsyncpa [#allocation3], 1 }

</bundles_post_ra>
